<compile_context>
chip_gen: v7x
topology: tpu7x:2x2x1
jax: 0.10.0
libtpu: 0.0.40
codegen_flags: <defaults>
</compile_context>

<pallas_src>
import functools

import jax
import jax.numpy as jnp
from jax.experimental import pallas as pl
from jax.experimental.pallas import tpu as pltpu

_LANES = 128
_SUBLANES = 8


def _round_up(x, m):
    return ((x + m - 1) // m) * m


def _single_shallow_kernel(params_ref, x_ref, o_ref, *, hidden_size, n_acc=4):
    # params_ref: SMEM f32[2*H + 2] = [d (H) | e (H) | A | B]
    #   forward:  y = A*x + B + sum_j e_j * |x + d_j|
    # x_ref / o_ref: VMEM f32[tile_rows, 128], samples lane-dense.
    h = hidden_size
    x = x_ref[...]
    a = params_ref[2 * h]
    b = params_ref[2 * h + 1]
    lin = x * a + b                      # folded linear part + output bias
    if h == 0:
        o_ref[...] = lin.astype(o_ref.dtype)
        return
    k_acc = max(1, min(n_acc, h))
    accs = [None] * k_acc
    # Unrolled VPU loop: 4 ops per hidden unit, spread over k_acc independent
    # accumulator chains so the 4 VALU slots stay fed (no long add chain).
    for j in range(h):
        term = jnp.abs(x + params_ref[j]) * params_ref[h + j]
        k = j % k_acc
        accs[k] = term if accs[k] is None else accs[k] + term
    total = lin
    for acc in accs:
        total = total + acc
    o_ref[...] = total.astype(o_ref.dtype)


def _fold_params(w1, b1, w2, b2):
    """Host-side fold of (w1, b1, w2, b2) into [d | e | A | B] (see kernel)."""
    w1f = w1.reshape(-1).astype(jnp.float32)
    b1f = b1.reshape(-1).astype(jnp.float32)
    w2f = w2.reshape(-1).astype(jnp.float32)
    b2f = jnp.asarray(b2, jnp.float32).reshape(())

    safe = w1f != 0.0
    d = jnp.where(safe, b1f / jnp.where(safe, w1f, 1.0), 0.0)
    e = jnp.where(safe, 0.5 * w2f * jnp.abs(w1f), 0.0)
    a = 0.5 * jnp.sum(w2f * w1f)                      # w1_j == 0 contributes 0
    b = (0.5 * jnp.sum(jnp.where(safe, w2f * b1f, 0.0))
         + jnp.sum(jnp.where(safe, 0.0, w2f * jnp.maximum(b1f, 0.0)))
         + b2f)
    return jnp.concatenate([d, e, jnp.stack([a, b])])


def _choose_tile_rows(n_rows, rows_per_tile):
    """Tile height: multiple of 8, <= rows_per_tile, targeting an even number
    (>=2) of grid steps so v7x's two TensorCores both get work.  n_rows need
    not be a multiple of the result: Pallas masks the partial boundary block."""
    if n_rows <= _SUBLANES:
        return max(n_rows, 1)                 # single full-array block
    steps = max(2, pl.cdiv(n_rows, rows_per_tile))
    if steps % 2:
        steps += 1                            # balanced across 2 TCs
    return _round_up(pl.cdiv(n_rows, steps), _SUBLANES)


def single_shallow_forward(x, w1, b1, w2, b2, *, rows_per_tile=2048):
    """Forward pass of SingleShallow.

    x:  (N, 1) float32
    w1: (1, H)  b1: (1, H)   in_layer  (stored transposed vs torch.nn.Linear)
    w2: (H, 1)  b2: (1, 1)   out_layer (stored transposed vs torch.nn.Linear)
    """
    n = x.shape[0]
    h = w1.shape[1]

    params = _fold_params(w1, b1, w2, b2)      # (2*H + 2,) f32 -> SMEM prefetch

    # Lane-dense layout: (N, 1) -> (rows, 128).  Zero relayout copies when
    # N % 128 == 0; otherwise pad only the ragged tail to the next 128.
    # TODO(synk): for very large ragged N the tail pad/slice still costs one
    # HBM round trip each way; a flat lane-dense API boundary would remove it.
    xf = x.reshape(-1)
    n_pad = _round_up(max(n, 1), _LANES)
    if n_pad != n:
        xf = jnp.pad(xf, (0, n_pad - n))
    n_rows = n_pad // _LANES
    x2d = xf.reshape(n_rows, _LANES)

    tile_rows = _choose_tile_rows(n_rows, rows_per_tile)
    grid = (pl.cdiv(n_rows, tile_rows),)

    kernel = functools.partial(_single_shallow_kernel, hidden_size=h)
    cost = pl.CostEstimate(
        flops=(4 * h + 4) * n_pad,
        transcendentals=0,
        bytes_accessed=2 * n_pad * 4 + int(params.size) * 4,
    )

    out2d = pl.pallas_call(
        kernel,
        out_shape=jax.ShapeDtypeStruct((n_rows, _LANES), x.dtype),
        grid_spec=pltpu.PrefetchScalarGridSpec(
            num_scalar_prefetch=1,             # params land in SMEM pre-grid
            grid=grid,
            in_specs=[pl.BlockSpec((tile_rows, _LANES), lambda i, p: (i, 0))],
            out_specs=pl.BlockSpec((tile_rows, _LANES), lambda i, p: (i, 0)),
        ),
        compiler_params=pltpu.CompilerParams(
            dimension_semantics=("parallel",),
        ),
        cost_estimate=cost,
    )(params, x2d)

    out = out2d.reshape(-1)
    if n_pad != n:
        out = out[:n]
    return out.reshape(n, 1)


def init_params(key, hidden_size):
    """Deterministic init mimicking nn.Linear default (uniform +/- 1/sqrt(fan_in))."""
    k1, k2, k3, k4 = jax.random.split(key, 4)
    bound1 = 1.0                                  # Linear(1, hidden): fan_in = 1
    w1 = jax.random.uniform(k1, (1, hidden_size), jnp.float32, -bound1, bound1)
    b1 = jax.random.uniform(k2, (1, hidden_size), jnp.float32, -bound1, bound1)
    bound2 = 1.0 / (hidden_size ** 0.5)           # Linear(hidden, 1)
    w2 = jax.random.uniform(k3, (hidden_size, 1), jnp.float32, -bound2, bound2)
    b2 = jax.random.uniform(k4, (1, 1), jnp.float32, -bound2, bound2)
    return w1, b1, w2, b2


def reference_forward(x, w1, b1, w2, b2):
    hid = jnp.maximum(x @ w1 + b1, 0.0)
    return hid @ w2 + b2


if __name__ == "__main__":
    key = jax.random.PRNGKey(0)
    k_x, k_p = jax.random.split(key)

    n_samples = 1000   # deliberately not a multiple of 128 to exercise padding
    hidden = 32

    x = jax.random.normal(k_x, (n_samples, 1), jnp.float32)
    w1, b1, w2, b2 = init_params(k_p, hidden)

    out = single_shallow_forward(x, w1, b1, w2, b2)
    out = jax.block_until_ready(out)

    ref = reference_forward(x, w1, b1, w2, b2)
    assert out.shape == (n_samples, 1)
    # Slightly looser tolerance: the abs/division refactor rounds differently
    # than the straight relu reference (error ~few * 1e-6 at H=32).
    err = float(jnp.max(jnp.abs(out - ref)))
    assert jnp.allclose(out, ref, atol=1e-4, rtol=1e-4), f"max abs err {err}"

    print("KERNEL_OK")
</pallas_src>

<mosaic_0001>
module attributes {stable_mosaic.version = 11 : i64} {
  func.func @_single_shallow_kernel(%arg0: i32, %arg1: memref<66xf32, #tpu.memory_space<smem>>, %arg2: memref<8x128xf32, #tpu.memory_space<vmem>>, %arg3: memref<8x128xf32, #tpu.memory_space<vmem>>) attributes {dimension_semantics = [#tpu.dimension_semantics<parallel>], iteration_bounds = array<i64: 1>, scalar_prefetch = 1 : i64, scratch_operands = 0 : i64, tpu.core_type = #tpu.core_type<tc>, window_params = [{transform_indices = @transform_0, window_bounds = array<i64: 8, 128>}, {transform_indices = @transform_1, window_bounds = array<i64: 8, 128>}]} {
    %c0 = arith.constant 0 : index
    %c0_0 = arith.constant 0 : index
    %0 = vector.load %arg2[%c0, %c0_0] : memref<8x128xf32, #tpu.memory_space<vmem>>, vector<8x128xf32>
    %c64 = arith.constant 64 : index
    %1 = memref.load %arg1[%c64] : memref<66xf32, #tpu.memory_space<smem>>
    %c65 = arith.constant 65 : index
    %2 = memref.load %arg1[%c65] : memref<66xf32, #tpu.memory_space<smem>>
    %3 = vector.broadcast %1 : f32 to vector<8x128xf32>
    %4 = arith.mulf %0, %3 : vector<8x128xf32>
    %5 = vector.broadcast %2 : f32 to vector<8x128xf32>
    %6 = arith.addf %4, %5 : vector<8x128xf32>
    %c0_1 = arith.constant 0 : index
    %7 = memref.load %arg1[%c0_1] : memref<66xf32, #tpu.memory_space<smem>>
    %8 = vector.broadcast %7 : f32 to vector<8x128xf32>
    %9 = arith.addf %0, %8 : vector<8x128xf32>
    %10 = math.absf %9 : vector<8x128xf32>
    %c32 = arith.constant 32 : index
    %11 = memref.load %arg1[%c32] : memref<66xf32, #tpu.memory_space<smem>>
    %12 = vector.broadcast %11 : f32 to vector<8x128xf32>
    %13 = arith.mulf %10, %12 : vector<8x128xf32>
    %c1 = arith.constant 1 : index
    %14 = memref.load %arg1[%c1] : memref<66xf32, #tpu.memory_space<smem>>
    %15 = vector.broadcast %14 : f32 to vector<8x128xf32>
    %16 = arith.addf %0, %15 : vector<8x128xf32>
    %17 = math.absf %16 : vector<8x128xf32>
    %c33 = arith.constant 33 : index
    %18 = memref.load %arg1[%c33] : memref<66xf32, #tpu.memory_space<smem>>
    %19 = vector.broadcast %18 : f32 to vector<8x128xf32>
    %20 = arith.mulf %17, %19 : vector<8x128xf32>
    %c2 = arith.constant 2 : index
    %21 = memref.load %arg1[%c2] : memref<66xf32, #tpu.memory_space<smem>>
    %22 = vector.broadcast %21 : f32 to vector<8x128xf32>
    %23 = arith.addf %0, %22 : vector<8x128xf32>
    %24 = math.absf %23 : vector<8x128xf32>
    %c34 = arith.constant 34 : index
    %25 = memref.load %arg1[%c34] : memref<66xf32, #tpu.memory_space<smem>>
    %26 = vector.broadcast %25 : f32 to vector<8x128xf32>
    %27 = arith.mulf %24, %26 : vector<8x128xf32>
    %c3 = arith.constant 3 : index
    %28 = memref.load %arg1[%c3] : memref<66xf32, #tpu.memory_space<smem>>
    %29 = vector.broadcast %28 : f32 to vector<8x128xf32>
    %30 = arith.addf %0, %29 : vector<8x128xf32>
    %31 = math.absf %30 : vector<8x128xf32>
    %c35 = arith.constant 35 : index
    %32 = memref.load %arg1[%c35] : memref<66xf32, #tpu.memory_space<smem>>
    %33 = vector.broadcast %32 : f32 to vector<8x128xf32>
    %34 = arith.mulf %31, %33 : vector<8x128xf32>
    %c4 = arith.constant 4 : index
    %35 = memref.load %arg1[%c4] : memref<66xf32, #tpu.memory_space<smem>>
    %36 = vector.broadcast %35 : f32 to vector<8x128xf32>
    %37 = arith.addf %0, %36 : vector<8x128xf32>
    %38 = math.absf %37 : vector<8x128xf32>
    %c36 = arith.constant 36 : index
    %39 = memref.load %arg1[%c36] : memref<66xf32, #tpu.memory_space<smem>>
    %40 = vector.broadcast %39 : f32 to vector<8x128xf32>
    %41 = arith.mulf %38, %40 : vector<8x128xf32>
    %42 = arith.addf %13, %41 : vector<8x128xf32>
    %c5 = arith.constant 5 : index
    %43 = memref.load %arg1[%c5] : memref<66xf32, #tpu.memory_space<smem>>
    %44 = vector.broadcast %43 : f32 to vector<8x128xf32>
    %45 = arith.addf %0, %44 : vector<8x128xf32>
    %46 = math.absf %45 : vector<8x128xf32>
    %c37 = arith.constant 37 : index
    %47 = memref.load %arg1[%c37] : memref<66xf32, #tpu.memory_space<smem>>
    %48 = vector.broadcast %47 : f32 to vector<8x128xf32>
    %49 = arith.mulf %46, %48 : vector<8x128xf32>
    %50 = arith.addf %20, %49 : vector<8x128xf32>
    %c6 = arith.constant 6 : index
    %51 = memref.load %arg1[%c6] : memref<66xf32, #tpu.memory_space<smem>>
    %52 = vector.broadcast %51 : f32 to vector<8x128xf32>
    %53 = arith.addf %0, %52 : vector<8x128xf32>
    %54 = math.absf %53 : vector<8x128xf32>
    %c38 = arith.constant 38 : index
    %55 = memref.load %arg1[%c38] : memref<66xf32, #tpu.memory_space<smem>>
    %56 = vector.broadcast %55 : f32 to vector<8x128xf32>
    %57 = arith.mulf %54, %56 : vector<8x128xf32>
    %58 = arith.addf %27, %57 : vector<8x128xf32>
    %c7 = arith.constant 7 : index
    %59 = memref.load %arg1[%c7] : memref<66xf32, #tpu.memory_space<smem>>
    %60 = vector.broadcast %59 : f32 to vector<8x128xf32>
    %61 = arith.addf %0, %60 : vector<8x128xf32>
    %62 = math.absf %61 : vector<8x128xf32>
    %c39 = arith.constant 39 : index
    %63 = memref.load %arg1[%c39] : memref<66xf32, #tpu.memory_space<smem>>
    %64 = vector.broadcast %63 : f32 to vector<8x128xf32>
    %65 = arith.mulf %62, %64 : vector<8x128xf32>
    %66 = arith.addf %34, %65 : vector<8x128xf32>
    %c8 = arith.constant 8 : index
    %67 = memref.load %arg1[%c8] : memref<66xf32, #tpu.memory_space<smem>>
    %68 = vector.broadcast %67 : f32 to vector<8x128xf32>
    %69 = arith.addf %0, %68 : vector<8x128xf32>
    %70 = math.absf %69 : vector<8x128xf32>
    %c40 = arith.constant 40 : index
    %71 = memref.load %arg1[%c40] : memref<66xf32, #tpu.memory_space<smem>>
    %72 = vector.broadcast %71 : f32 to vector<8x128xf32>
    %73 = arith.mulf %70, %72 : vector<8x128xf32>
    %74 = arith.addf %42, %73 : vector<8x128xf32>
    %c9 = arith.constant 9 : index
    %75 = memref.load %arg1[%c9] : memref<66xf32, #tpu.memory_space<smem>>
    %76 = vector.broadcast %75 : f32 to vector<8x128xf32>
    %77 = arith.addf %0, %76 : vector<8x128xf32>
    %78 = math.absf %77 : vector<8x128xf32>
    %c41 = arith.constant 41 : index
    %79 = memref.load %arg1[%c41] : memref<66xf32, #tpu.memory_space<smem>>
    %80 = vector.broadcast %79 : f32 to vector<8x128xf32>
    %81 = arith.mulf %78, %80 : vector<8x128xf32>
    %82 = arith.addf %50, %81 : vector<8x128xf32>
    %c10 = arith.constant 10 : index
    %83 = memref.load %arg1[%c10] : memref<66xf32, #tpu.memory_space<smem>>
    %84 = vector.broadcast %83 : f32 to vector<8x128xf32>
    %85 = arith.addf %0, %84 : vector<8x128xf32>
    %86 = math.absf %85 : vector<8x128xf32>
    %c42 = arith.constant 42 : index
    %87 = memref.load %arg1[%c42] : memref<66xf32, #tpu.memory_space<smem>>
    %88 = vector.broadcast %87 : f32 to vector<8x128xf32>
    %89 = arith.mulf %86, %88 : vector<8x128xf32>
    %90 = arith.addf %58, %89 : vector<8x128xf32>
    %c11 = arith.constant 11 : index
    %91 = memref.load %arg1[%c11] : memref<66xf32, #tpu.memory_space<smem>>
    %92 = vector.broadcast %91 : f32 to vector<8x128xf32>
    %93 = arith.addf %0, %92 : vector<8x128xf32>
    %94 = math.absf %93 : vector<8x128xf32>
    %c43 = arith.constant 43 : index
    %95 = memref.load %arg1[%c43] : memref<66xf32, #tpu.memory_space<smem>>
    %96 = vector.broadcast %95 : f32 to vector<8x128xf32>
    %97 = arith.mulf %94, %96 : vector<8x128xf32>
    %98 = arith.addf %66, %97 : vector<8x128xf32>
    %c12 = arith.constant 12 : index
    %99 = memref.load %arg1[%c12] : memref<66xf32, #tpu.memory_space<smem>>
    %100 = vector.broadcast %99 : f32 to vector<8x128xf32>
    %101 = arith.addf %0, %100 : vector<8x128xf32>
    %102 = math.absf %101 : vector<8x128xf32>
    %c44 = arith.constant 44 : index
    %103 = memref.load %arg1[%c44] : memref<66xf32, #tpu.memory_space<smem>>
    %104 = vector.broadcast %103 : f32 to vector<8x128xf32>
    %105 = arith.mulf %102, %104 : vector<8x128xf32>
    %106 = arith.addf %74, %105 : vector<8x128xf32>
    %c13 = arith.constant 13 : index
    %107 = memref.load %arg1[%c13] : memref<66xf32, #tpu.memory_space<smem>>
    %108 = vector.broadcast %107 : f32 to vector<8x128xf32>
    %109 = arith.addf %0, %108 : vector<8x128xf32>
    %110 = math.absf %109 : vector<8x128xf32>
    %c45 = arith.constant 45 : index
    %111 = memref.load %arg1[%c45] : memref<66xf32, #tpu.memory_space<smem>>
    %112 = vector.broadcast %111 : f32 to vector<8x128xf32>
    %113 = arith.mulf %110, %112 : vector<8x128xf32>
    %114 = arith.addf %82, %113 : vector<8x128xf32>
    %c14 = arith.constant 14 : index
    %115 = memref.load %arg1[%c14] : memref<66xf32, #tpu.memory_space<smem>>
    %116 = vector.broadcast %115 : f32 to vector<8x128xf32>
    %117 = arith.addf %0, %116 : vector<8x128xf32>
    %118 = math.absf %117 : vector<8x128xf32>
    %c46 = arith.constant 46 : index
    %119 = memref.load %arg1[%c46] : memref<66xf32, #tpu.memory_space<smem>>
    %120 = vector.broadcast %119 : f32 to vector<8x128xf32>
    %121 = arith.mulf %118, %120 : vector<8x128xf32>
    %122 = arith.addf %90, %121 : vector<8x128xf32>
    %c15 = arith.constant 15 : index
    %123 = memref.load %arg1[%c15] : memref<66xf32, #tpu.memory_space<smem>>
    %124 = vector.broadcast %123 : f32 to vector<8x128xf32>
    %125 = arith.addf %0, %124 : vector<8x128xf32>
    %126 = math.absf %125 : vector<8x128xf32>
    %c47 = arith.constant 47 : index
    %127 = memref.load %arg1[%c47] : memref<66xf32, #tpu.memory_space<smem>>
    %128 = vector.broadcast %127 : f32 to vector<8x128xf32>
    %129 = arith.mulf %126, %128 : vector<8x128xf32>
    %130 = arith.addf %98, %129 : vector<8x128xf32>
    %c16 = arith.constant 16 : index
    %131 = memref.load %arg1[%c16] : memref<66xf32, #tpu.memory_space<smem>>
    %132 = vector.broadcast %131 : f32 to vector<8x128xf32>
    %133 = arith.addf %0, %132 : vector<8x128xf32>
    %134 = math.absf %133 : vector<8x128xf32>
    %c48 = arith.constant 48 : index
    %135 = memref.load %arg1[%c48] : memref<66xf32, #tpu.memory_space<smem>>
    %136 = vector.broadcast %135 : f32 to vector<8x128xf32>
    %137 = arith.mulf %134, %136 : vector<8x128xf32>
    %138 = arith.addf %106, %137 : vector<8x128xf32>
    %c17 = arith.constant 17 : index
    %139 = memref.load %arg1[%c17] : memref<66xf32, #tpu.memory_space<smem>>
    %140 = vector.broadcast %139 : f32 to vector<8x128xf32>
    %141 = arith.addf %0, %140 : vector<8x128xf32>
    %142 = math.absf %141 : vector<8x128xf32>
    %c49 = arith.constant 49 : index
    %143 = memref.load %arg1[%c49] : memref<66xf32, #tpu.memory_space<smem>>
    %144 = vector.broadcast %143 : f32 to vector<8x128xf32>
    %145 = arith.mulf %142, %144 : vector<8x128xf32>
    %146 = arith.addf %114, %145 : vector<8x128xf32>
    %c18 = arith.constant 18 : index
    %147 = memref.load %arg1[%c18] : memref<66xf32, #tpu.memory_space<smem>>
    %148 = vector.broadcast %147 : f32 to vector<8x128xf32>
    %149 = arith.addf %0, %148 : vector<8x128xf32>
    %150 = math.absf %149 : vector<8x128xf32>
    %c50 = arith.constant 50 : index
    %151 = memref.load %arg1[%c50] : memref<66xf32, #tpu.memory_space<smem>>
    %152 = vector.broadcast %151 : f32 to vector<8x128xf32>
    %153 = arith.mulf %150, %152 : vector<8x128xf32>
    %154 = arith.addf %122, %153 : vector<8x128xf32>
    %c19 = arith.constant 19 : index
    %155 = memref.load %arg1[%c19] : memref<66xf32, #tpu.memory_space<smem>>
    %156 = vector.broadcast %155 : f32 to vector<8x128xf32>
    %157 = arith.addf %0, %156 : vector<8x128xf32>
    %158 = math.absf %157 : vector<8x128xf32>
    %c51 = arith.constant 51 : index
    %159 = memref.load %arg1[%c51] : memref<66xf32, #tpu.memory_space<smem>>
    %160 = vector.broadcast %159 : f32 to vector<8x128xf32>
    %161 = arith.mulf %158, %160 : vector<8x128xf32>
    %162 = arith.addf %130, %161 : vector<8x128xf32>
    %c20 = arith.constant 20 : index
    %163 = memref.load %arg1[%c20] : memref<66xf32, #tpu.memory_space<smem>>
    %164 = vector.broadcast %163 : f32 to vector<8x128xf32>
    %165 = arith.addf %0, %164 : vector<8x128xf32>
    %166 = math.absf %165 : vector<8x128xf32>
    %c52 = arith.constant 52 : index
    %167 = memref.load %arg1[%c52] : memref<66xf32, #tpu.memory_space<smem>>
    %168 = vector.broadcast %167 : f32 to vector<8x128xf32>
    %169 = arith.mulf %166, %168 : vector<8x128xf32>
    %170 = arith.addf %138, %169 : vector<8x128xf32>
    %c21 = arith.constant 21 : index
    %171 = memref.load %arg1[%c21] : memref<66xf32, #tpu.memory_space<smem>>
    %172 = vector.broadcast %171 : f32 to vector<8x128xf32>
    %173 = arith.addf %0, %172 : vector<8x128xf32>
    %174 = math.absf %173 : vector<8x128xf32>
    %c53 = arith.constant 53 : index
    %175 = memref.load %arg1[%c53] : memref<66xf32, #tpu.memory_space<smem>>
    %176 = vector.broadcast %175 : f32 to vector<8x128xf32>
    %177 = arith.mulf %174, %176 : vector<8x128xf32>
    %178 = arith.addf %146, %177 : vector<8x128xf32>
    %c22 = arith.constant 22 : index
    %179 = memref.load %arg1[%c22] : memref<66xf32, #tpu.memory_space<smem>>
    %180 = vector.broadcast %179 : f32 to vector<8x128xf32>
    %181 = arith.addf %0, %180 : vector<8x128xf32>
    %182 = math.absf %181 : vector<8x128xf32>
    %c54 = arith.constant 54 : index
    %183 = memref.load %arg1[%c54] : memref<66xf32, #tpu.memory_space<smem>>
    %184 = vector.broadcast %183 : f32 to vector<8x128xf32>
    %185 = arith.mulf %182, %184 : vector<8x128xf32>
    %186 = arith.addf %154, %185 : vector<8x128xf32>
    %c23 = arith.constant 23 : index
    %187 = memref.load %arg1[%c23] : memref<66xf32, #tpu.memory_space<smem>>
    %188 = vector.broadcast %187 : f32 to vector<8x128xf32>
    %189 = arith.addf %0, %188 : vector<8x128xf32>
    %190 = math.absf %189 : vector<8x128xf32>
    %c55 = arith.constant 55 : index
    %191 = memref.load %arg1[%c55] : memref<66xf32, #tpu.memory_space<smem>>
    %192 = vector.broadcast %191 : f32 to vector<8x128xf32>
    %193 = arith.mulf %190, %192 : vector<8x128xf32>
    %194 = arith.addf %162, %193 : vector<8x128xf32>
    %c24 = arith.constant 24 : index
    %195 = memref.load %arg1[%c24] : memref<66xf32, #tpu.memory_space<smem>>
    %196 = vector.broadcast %195 : f32 to vector<8x128xf32>
    %197 = arith.addf %0, %196 : vector<8x128xf32>
    %198 = math.absf %197 : vector<8x128xf32>
    %c56 = arith.constant 56 : index
    %199 = memref.load %arg1[%c56] : memref<66xf32, #tpu.memory_space<smem>>
    %200 = vector.broadcast %199 : f32 to vector<8x128xf32>
    %201 = arith.mulf %198, %200 : vector<8x128xf32>
    %202 = arith.addf %170, %201 : vector<8x128xf32>
    %c25 = arith.constant 25 : index
    %203 = memref.load %arg1[%c25] : memref<66xf32, #tpu.memory_space<smem>>
    %204 = vector.broadcast %203 : f32 to vector<8x128xf32>
    %205 = arith.addf %0, %204 : vector<8x128xf32>
    %206 = math.absf %205 : vector<8x128xf32>
    %c57 = arith.constant 57 : index
    %207 = memref.load %arg1[%c57] : memref<66xf32, #tpu.memory_space<smem>>
    %208 = vector.broadcast %207 : f32 to vector<8x128xf32>
    %209 = arith.mulf %206, %208 : vector<8x128xf32>
    %210 = arith.addf %178, %209 : vector<8x128xf32>
    %c26 = arith.constant 26 : index
    %211 = memref.load %arg1[%c26] : memref<66xf32, #tpu.memory_space<smem>>
    %212 = vector.broadcast %211 : f32 to vector<8x128xf32>
    %213 = arith.addf %0, %212 : vector<8x128xf32>
    %214 = math.absf %213 : vector<8x128xf32>
    %c58 = arith.constant 58 : index
    %215 = memref.load %arg1[%c58] : memref<66xf32, #tpu.memory_space<smem>>
    %216 = vector.broadcast %215 : f32 to vector<8x128xf32>
    %217 = arith.mulf %214, %216 : vector<8x128xf32>
    %218 = arith.addf %186, %217 : vector<8x128xf32>
    %c27 = arith.constant 27 : index
    %219 = memref.load %arg1[%c27] : memref<66xf32, #tpu.memory_space<smem>>
    %220 = vector.broadcast %219 : f32 to vector<8x128xf32>
    %221 = arith.addf %0, %220 : vector<8x128xf32>
    %222 = math.absf %221 : vector<8x128xf32>
    %c59 = arith.constant 59 : index
    %223 = memref.load %arg1[%c59] : memref<66xf32, #tpu.memory_space<smem>>
    %224 = vector.broadcast %223 : f32 to vector<8x128xf32>
    %225 = arith.mulf %222, %224 : vector<8x128xf32>
    %226 = arith.addf %194, %225 : vector<8x128xf32>
    %c28 = arith.constant 28 : index
    %227 = memref.load %arg1[%c28] : memref<66xf32, #tpu.memory_space<smem>>
    %228 = vector.broadcast %227 : f32 to vector<8x128xf32>
    %229 = arith.addf %0, %228 : vector<8x128xf32>
    %230 = math.absf %229 : vector<8x128xf32>
    %c60 = arith.constant 60 : index
    %231 = memref.load %arg1[%c60] : memref<66xf32, #tpu.memory_space<smem>>
    %232 = vector.broadcast %231 : f32 to vector<8x128xf32>
    %233 = arith.mulf %230, %232 : vector<8x128xf32>
    %234 = arith.addf %202, %233 : vector<8x128xf32>
    %c29 = arith.constant 29 : index
    %235 = memref.load %arg1[%c29] : memref<66xf32, #tpu.memory_space<smem>>
    %236 = vector.broadcast %235 : f32 to vector<8x128xf32>
    %237 = arith.addf %0, %236 : vector<8x128xf32>
    %238 = math.absf %237 : vector<8x128xf32>
    %c61 = arith.constant 61 : index
    %239 = memref.load %arg1[%c61] : memref<66xf32, #tpu.memory_space<smem>>
    %240 = vector.broadcast %239 : f32 to vector<8x128xf32>
    %241 = arith.mulf %238, %240 : vector<8x128xf32>
    %242 = arith.addf %210, %241 : vector<8x128xf32>
    %c30 = arith.constant 30 : index
    %243 = memref.load %arg1[%c30] : memref<66xf32, #tpu.memory_space<smem>>
    %244 = vector.broadcast %243 : f32 to vector<8x128xf32>
    %245 = arith.addf %0, %244 : vector<8x128xf32>
    %246 = math.absf %245 : vector<8x128xf32>
    %c62 = arith.constant 62 : index
    %247 = memref.load %arg1[%c62] : memref<66xf32, #tpu.memory_space<smem>>
    %248 = vector.broadcast %247 : f32 to vector<8x128xf32>
    %249 = arith.mulf %246, %248 : vector<8x128xf32>
    %250 = arith.addf %218, %249 : vector<8x128xf32>
    %c31 = arith.constant 31 : index
    %251 = memref.load %arg1[%c31] : memref<66xf32, #tpu.memory_space<smem>>
    %252 = vector.broadcast %251 : f32 to vector<8x128xf32>
    %253 = arith.addf %0, %252 : vector<8x128xf32>
    %254 = math.absf %253 : vector<8x128xf32>
    %c63 = arith.constant 63 : index
    %255 = memref.load %arg1[%c63] : memref<66xf32, #tpu.memory_space<smem>>
    %256 = vector.broadcast %255 : f32 to vector<8x128xf32>
    %257 = arith.mulf %254, %256 : vector<8x128xf32>
    %258 = arith.addf %226, %257 : vector<8x128xf32>
    %259 = arith.addf %6, %234 : vector<8x128xf32>
    %260 = arith.addf %259, %242 : vector<8x128xf32>
    %261 = arith.addf %260, %250 : vector<8x128xf32>
    %262 = arith.addf %261, %258 : vector<8x128xf32>
    %c0_2 = arith.constant 0 : index
    %c0_3 = arith.constant 0 : index
    %263 = vector.load %arg3[%c0_2, %c0_3] : memref<8x128xf32, #tpu.memory_space<vmem>>, vector<8x128xf32>
    tpu.vector_store %arg3[%c0_2, %c0_3], %262 {strides = array<i32>} : memref<8x128xf32, #tpu.memory_space<vmem>>, vector<8x128xf32>,
    return
  }
  func.func @transform_0(%arg0: i32, %arg1: memref<66xf32, #tpu.memory_space<smem>>) -> (i32, i32) {
    %c0_i32 = arith.constant 0 : i32
    %c0_i32_0 = arith.constant 0 : i32
    return %arg0, %c0_i32 : i32, i32
  }
  func.func @transform_1(%arg0: i32, %arg1: memref<66xf32, #tpu.memory_space<smem>>) -> (i32, i32) {
    %c0_i32 = arith.constant 0 : i32
    %c0_i32_0 = arith.constant 0 : i32
    return %arg0, %c0_i32 : i32, i32
  }
}

</mosaic_0001>

<bundles_post_ra>
// kernel: tpu_custom_call.1
= control target key start
LH: loop header
LB: loop body
LE: loop exit
PB: predicated region body
PF: predicated region fallthrough
CT: control target
= control target key end

     0   :  { %s708_s0 = inlined_call_operand.hbm [shape: f32[66], index: 0, kind: input, shape index: {}]   ;;  %s709_s1 = inlined_call_operand.hbm [shape: f32[8,128], index: 1, kind: input, shape index: {}]   ;;  %s710_s2 = inlined_call_operand.hbm [shape: f32[8,128], index: 2, kind: output, shape index: {}]  }
   0x1   :  { %s373_s11 = scalar_lea.hbm %s708_s0, 16 }
   0x2   :  { %p374_p0 = scmp.ne.s32.totalorder %s708_s0, %s373_s11  ;;  %p377_p1 = scmp.lt.u32.totalorder %s373_s11, %s708_s0 }
   0x4   :  { %p379_p2 = pnand %p377_p1, %p374_p0 }
   0x6   :  { %382 = shalt.err (!%p379_p2)  }
   0x7   :  { %s433_s16 = smov [#allocation3]  }
   0x8   :  { %8 = dma.hbm_to_smem %s708_s0, 16, %s433_s16, [#allocation2] }
   0x9   :  { %427 = dma.done.wait [#allocation2], 16 }
   0xa   :  { %428 = vsyncadd [#allocation2], 4294967280 }
   0xb   :  { %10 = sfence }
   0xc   :  { %11 = vsyncpa [#allocation5], 0 }
   0xd   :  { %12 = vsyncpa [#allocation6], 0  ;;  %s434_s19 = smov [#allocation4]   ;;  %s383_s23 = scalar_lea.hbm %s709_s1, 128 }
   0xe   :  { %s19_s20 = sshll.u32 %s434_s19, 4  ;;  %p384_p3 = scmp.ne.s32.totalorder %s709_s1, %s383_s23  ;;  %s20_s20 = int_to_ptr.vmem [resolvable:$true] %s19_s20 }
   0xf   :  { %p387_p4 = scmp.lt.u32.totalorder %s383_s23, %s709_s1 }
  0x11   :  { %p389_p5 = pnand %p387_p4, %p384_p3 }
  0x13   :  { %392 = shalt.err (!%p389_p5)
}
  0x14   :  { %s393_s0 = scalar_lea.vmem %s20_s20, 128  ;;  %p398_p7 = scmp.lt.s32.totalorder %s20_s20, %s20_s20 }
  0x15   :  { %p394_p6 = scmp.ne.s32.totalorder %s20_s20, %s393_s0  ;;  %p399_p8 = scmp.lt.s32.totalorder %s393_s0, %s393_s0 }
  0x17   :  { %p400_p9 = por %p399_p8, %p398_p7 }
  0x19   :  { %p401_p10 = pnand %p400_p9, %p394_p6 }
  0x1b   :  { %404 = shalt.err (!%p401_p10)
}
  0x1c   :  { %22 = dma.hbm_to_vmem [thread:$0]  %s709_s1, 128, %s20_s20, [#allocation5]  }
  0x1d   :  { %429 = dma.done.wait [#allocation5], 128  }
  0x1e   :  { %430 = vsyncadd [#allocation5], 4294967168  ;;  %s305_s30 = sld [smem:[#allocation3 + $0x40]]  ;;  %s306_s3 = sld [smem:[#allocation3 + $0x41]]  ;;  %v489_v0 = vld [vmem:[#allocation4] sm:$0xff] }
  0x1f   :  { %s33_s4 = sld [smem:[#allocation3]]  ;;  %s308_s6 = sld [smem:[#allocation3 + $0x1]] }
  0x20   :  { %s475_s5 = sld [smem:[#allocation3 + $0x20]]  ;;  %s477_s7 = sld [smem:[#allocation3 + $0x21]] }
  0x21   :  { %s310_s8 = sld [smem:[#allocation3 + $0x2]]  ;;  %s481_s10 = sld [smem:[#allocation3 + $0x3]] }
  0x22   :  { %s479_s9 = sld [smem:[#allocation3 + $0x22]]  ;;  %s483_s11 = sld [smem:[#allocation3 + $0x23]] }
  0x23   :  { %s485_s12 = sld [smem:[#allocation3 + $0x4]]  ;;  %s491_s13 = sld [smem:[#allocation3 + $0x5]] }
  0x24   :  { %s487_s1 = sld [smem:[#allocation3 + $0x24]]  ;;  %v29_v1 = vstv %s305_s30  ;;  %s493_s14 = sld [smem:[#allocation3 + $0x25]]  ;;  %v31_v3 = vstv %s306_s3 }
  0x25   :  { %v30_v2 = vmul.f32 %v29_v1, %v489_v0  ;;  %v34_v4 = vstv %s33_s4  ;;  %s496_s15 = sld [smem:[#allocation3 + $0x6]]  ;;  %v41_v6 = vstv %s308_s6  ;;  %s501_s17 = sld [smem:[#allocation3 + $0x7]] }
  0x26   :  { %v35_v5 = vadd.f32 %v34_v4, %v489_v0  ;;  %s499_s16 = sld [smem:[#allocation3 + $0x26]]  ;;  %v38_v7 = vstv %s475_s5  ;;  %v42_v8 = vadd.f32 %v41_v6, %v489_v0  ;;  %v45_v9 = vstv %s477_s7  ;;  %s506_s18 = sld [smem:[#allocation3 + $0x27]] }
  0x27   :  { %v48_v10 = vstv %s310_s8  ;;  %s508_s19 = sld [smem:[#allocation3 + $0x8]]  ;;  %v510_v11 = vadd.f32 %v31_v3, %v30_v2  ;;  %v55_v14 = vstv %s481_s10  ;;  %s516_s21 = sld [smem:[#allocation3 + $0x9]] }
  0x28   :  { %v36_v12 = vand.u32 2147483647, %v35_v5  ;;  %v49_v13 = vadd.f32 %v48_v10, %v489_v0  ;;  %s514_s20 = sld [smem:[#allocation3 + $0x28]]  ;;  %v43_v15 = vand.u32 2147483647, %v42_v8  ;;  %v52_v16 = vstv %s479_s9  ;;  %s521_s22 = sld [smem:[#allocation3 + $0x29]] }
  0x29   :  { %v56_v17 = vadd.f32 %v55_v14, %v489_v0  ;;  %v62_v18 = vstv %s485_s12  ;;  %v59_v20 = vstv %s483_s11  ;;  %v70_v22 = vstv %s491_s13  ;;  %s526_s23 = sld [smem:[#allocation3 + $0xa]]  ;;  %s528_s24 = sld [smem:[#allocation3 + $0xb]] }
  0x2a   :  { %v50_v19 = vand.u32 2147483647, %v49_v13  ;;  %v63_v21 = vadd.f32 %v62_v18, %v489_v0  ;;  %v39_v23 = vmul.f32 %v38_v7, %v36_v12  ;;  %v46_v24 = vmul.f32 %v45_v9, %v43_v15  ;;  %s532_s25 = sld [smem:[#allocation3 + $0x2a]]  ;;  %s536_s26 = sld [smem:[#allocation3 + $0xc]] }
  0x2b   :  { %v66_v25 = vstv %s487_s1  ;;  %v71_v26 = vadd.f32 %v70_v22, %v489_v0  ;;  %v57_v27 = vand.u32 2147483647, %v56_v17  ;;  %v74_v29 = vstv %s493_s14  ;;  %s540_s27 = sld [smem:[#allocation3 + $0x2b]]  ;;  %s545_s0 = sld [smem:[#allocation3 + $0x2c]] }
  0x2c   :  { %v64_v28 = vand.u32 2147483647, %v63_v21  ;;  %v78_v30 = vstv %s496_s15  ;;  %v53_v31 = vmul.f32 %v52_v16, %v50_v19  ;;  %v86_v34 = vstv %s501_s17  ;;  %s547_s28 = sld [smem:[#allocation3 + $0xd]]  ;;  %s555_s30 = sld [smem:[#allocation3 + $0xe]] }
  0x2d   :  { %v72_v32 = vand.u32 2147483647, %v71_v26  ;;  %v79_v33 = vadd.f32 %v78_v30, %v489_v0  ;;  %v82_v36 = vstv %s499_s16  ;;  %v87_v37 = vadd.f32 %v86_v34, %v489_v0  ;;  %s551_s29 = sld [smem:[#allocation3 + $0x2d]]  ;;  %s557_s3 = sld [smem:[#allocation3 + $0xf]] }
  0x2e   :  { %v67_v35 = vmul.f32 %v66_v25, %v64_v28  ;;  %v94_v38 = vstv %s508_s19  ;;  %v90_v41 = vstv %s506_s18  ;;  %v60_v43 = vmul.f32 %v59_v20, %v57_v27  ;;  %s563_s4 = sld [smem:[#allocation3 + $0x2e]]  ;;  %s565_s5 = sld [smem:[#allocation3 + $0x10]] }
  0x2f   :  { %v75_v39 = vmul.f32 %v74_v29, %v72_v32  ;;  %v80_v40 = vand.u32 2147483647, %v79_v33  ;;  %v95_v42 = vadd.f32 %v94_v38, %v489_v0  ;;  %v88_v44 = vand.u32 2147483647, %v87_v37  ;;  %s568_s6 = sld [smem:[#allocation3 + $0x2f]]  ;;  %s573_s7 = sld [smem:[#allocation3 + $0x30]] }
  0x30   :  { %v98_v45 = vstv %s514_s20  ;;  %v102_v46 = vstv %s516_s21  ;;  %v68_v47 = vadd.f32 %v67_v35, %v39_v23  ;;  %v106_v52 = vstv %s521_s22  ;;  %s575_s8 = sld [smem:[#allocation3 + $0x11]]  ;;  %s583_s10 = sld [smem:[#allocation3 + $0x12]] }
  0x31   :  { %v83_v48 = vmul.f32 %v82_v36, %v80_v40  ;;  %v96_v49 = vand.u32 2147483647, %v95_v42  ;;  %v103_v50 = vadd.f32 %v102_v46, %v489_v0  ;;  %v91_v51 = vmul.f32 %v90_v41, %v88_v44  ;;  %s579_s9 = sld [smem:[#allocation3 + $0x31]]  ;;  %s585_s11 = sld [smem:[#allocation3 + $0x13]] }
  0x32   :  { %v110_v53 = vstv %s526_s23  ;;  %v118_v54 = vstv %s528_s24  ;;  %v76_v55 = vadd.f32 %v75_v39, %v46_v24  ;;  %v114_v60 = vstv %s532_s25  ;;  %s591_s12 = sld [smem:[#allocation3 + $0x32]]  ;;  %s593_s1 = sld [smem:[#allocation3 + $0x14]] }
  0x33   :  { %v99_v56 = vmul.f32 %v98_v45, %v96_v49  ;;  %v104_v57 = vand.u32 2147483647, %v103_v50  ;;  %v111_v58 = vadd.f32 %v110_v53, %v489_v0  ;;  %v84_v59 = vadd.f32 %v83_v48, %v53_v31  ;;  %s596_s13 = sld [smem:[#allocation3 + $0x33]]  ;;  %s601_s14 = sld [smem:[#allocation3 + $0x34]] }
  0x34   :  { %v119_v61 = vadd.f32 %v118_v54, %v489_v0  ;;  %v126_v62 = vstv %s536_s26  ;;  %v122_v2 = vstv %s540_s27  ;;  %v92_v4 = vadd.f32 %v91_v51, %v60_v43  ;;  %s603_s15 = sld [smem:[#allocation3 + $0x15]]  ;;  %s611_s17 = sld [smem:[#allocation3 + $0x16]] }
  0x35   :  { %v107_v63 = vmul.f32 %v106_v52, %v104_v57  ;;  %v112_v1 = vand.u32 2147483647, %v111_v58  ;;  %v127_v3 = vadd.f32 %v126_v62, %v489_v0  ;;  %v130_v6 = vstv %s545_s0  ;;  %s607_s16 = sld [smem:[#allocation3 + $0x35]]  ;;  %s613_s18 = sld [smem:[#allocation3 + $0x17]] }
  0x36   :  { %v120_v5 = vand.u32 2147483647, %v119_v61  ;;  %v134_v7 = vstv %s547_s28  ;;  %v100_v8 = vadd.f32 %v99_v56, %v68_v47  ;;  %v138_v14 = vstv %s551_s29  ;;  %s619_s19 = sld [smem:[#allocation3 + $0x36]]  ;;  %s621_s20 = sld [smem:[#allocation3 + $0x18]] }
  0x37   :  { %v115_v9 = vmul.f32 %v114_v60, %v112_v1  ;;  %v128_v10 = vand.u32 2147483647, %v127_v3  ;;  %v135_v12 = vadd.f32 %v134_v7, %v489_v0  ;;  %v142_v15 = vstv %s555_s30  ;;  %s624_s21 = sld [smem:[#allocation3 + $0x37]]  ;;  %s629_s22 = sld [smem:[#allocation3 + $0x38]] }
  0x38   :  { %v123_v13 = vmul.f32 %v122_v2, %v120_v5  ;;  %v150_v16 = vstv %s557_s3  ;;  %v108_v17 = vadd.f32 %v107_v63, %v76_v55  ;;  %v143_v20 = vadd.f32 %v142_v15, %v489_v0  ;;  %s631_s23 = sld [smem:[#allocation3 + $0x19]]  ;;  %s639_s25 = sld [smem:[#allocation3 + $0x1a]] }
  0x39   :  { %v131_v18 = vmul.f32 %v130_v6, %v128_v10  ;;  %v136_v19 = vand.u32 2147483647, %v135_v12  ;;  %v116_v21 = vadd.f32 %v115_v9, %v84_v59  ;;  %v146_v22 = vstv %s563_s4  ;;  %s635_s24 = sld [smem:[#allocation3 + $0x39]]  ;;  %s641_s26 = sld [smem:[#allocation3 + $0x1b]] }
  0x3a   :  { %v151_v23 = vadd.f32 %v150_v16, %v489_v0  ;;  %v158_v24 = vstv %s565_s5  ;;  %v144_v26 = vand.u32 2147483647, %v143_v20  ;;  %v154_v27 = vstv %s568_s6  ;;  %s647_s27 = sld [smem:[#allocation3 + $0x3a]]  ;;  %s649_s0 = sld [smem:[#allocation3 + $0x1c]] }
  0x3b   :  { %v139_v25 = vmul.f32 %v138_v14, %v136_v19  ;;  %v159_v28 = vadd.f32 %v158_v24, %v489_v0  ;;  %v124_v29 = vadd.f32 %v123_v13, %v92_v4  ;;  %v162_v31 = vstv %s573_s7  ;;  %s652_s28 = sld [smem:[#allocation3 + $0x3b]]  ;;  %s657_s29 = sld [smem:[#allocation3 + $0x3c]] }
  0x3c   :  { %v152_v30 = vand.u32 2147483647, %v151_v23  ;;  %v166_v32 = vstv %s575_s8  ;;  %v132_v33 = vadd.f32 %v131_v18, %v100_v8  ;;  %v147_v34 = vmul.f32 %v146_v22, %v144_v26  ;;  %s659_s30 = sld [smem:[#allocation3 + $0x1d]]  ;;  %s667_s4 = sld [smem:[#allocation3 + $0x1e]] }
  0x3d   :  { %v160_v35 = vand.u32 2147483647, %v159_v28  ;;  %v167_v36 = vadd.f32 %v166_v32, %v489_v0  ;;  %v170_v38 = vstv %s579_s9  ;;  %v174_v39 = vstv %s583_s10  ;;  %s663_s3 = sld [smem:[#allocation3 + $0x3d]]  ;;  %s669_s5 = sld [smem:[#allocation3 + $0x1f]] }
  0x3e   :  { %v155_v37 = vmul.f32 %v154_v27, %v152_v30  ;;  %v182_v40 = vstv %s585_s11  ;;  %v140_v41 = vadd.f32 %v139_v25, %v108_v17  ;;  %v175_v44 = vadd.f32 %v174_v39, %v489_v0  ;;  %s675_s6 = sld [smem:[#allocation3 + $0x3e]]  ;;  %s678_s7 = sld [smem:[#allocation3 + $0x3f]] }
  0x3f   :  { %v163_v42 = vmul.f32 %v162_v31, %v160_v35  ;;  %v168_v43 = vand.u32 2147483647, %v167_v36  ;;  %v148_v45 = vadd.f32 %v147_v34, %v116_v21  ;;  %v178_v46 = vstv %s591_s12  ;;  %s435_s8 = smov [#allocation7]  }
  0x40   :  { %v183_v47 = vadd.f32 %v182_v40, %v489_v0  ;;  %v190_v48 = vstv %s593_s1  ;;  %v176_v50 = vand.u32 2147483647, %v175_v44  ;;  %v186_v51 = vstv %s596_s13  ;;  %s296_s9 = sshll.u32 %s435_s8, 4  ;;  %s297_s9 = int_to_ptr.vmem [resolvable:$true] %s296_s9 }
  0x41   :  { %v171_v49 = vmul.f32 %v170_v38, %v168_v43  ;;  %v191_v52 = vadd.f32 %v190_v48, %v489_v0  ;;  %v156_v53 = vadd.f32 %v155_v37, %v124_v29  ;;  %v194_v55 = vstv %s601_s14  ;;  %s405_s10 = scalar_lea.vmem %s297_s9, 128  ;;  %p410_p12 = scmp.lt.s32.totalorder %s297_s9, %s297_s9 }
  0x42   :  { %v184_v54 = vand.u32 2147483647, %v183_v47  ;;  %v198_v56 = vstv %s603_s15  ;;  %v164_v57 = vadd.f32 %v163_v42, %v132_v33  ;;  %v179_v58 = vmul.f32 %v178_v46, %v176_v50  ;;  %p406_p11 = scmp.ne.s32.totalorder %s297_s9, %s405_s10  ;;  %p411_p13 = scmp.lt.s32.totalorder %s405_s10, %s405_s10 }
  0x43   :  { %v192_v59 = vand.u32 2147483647, %v191_v52  ;;  %v199_v60 = vadd.f32 %v198_v56, %v489_v0  ;;  %v202_v62 = vstv %s607_s16  ;;  %v206_v63 = vstv %s611_s17 }
  0x44   :  { %v187_v61 = vmul.f32 %v186_v51, %v184_v54  ;;  %v214_v1 = vstv %s613_s18  ;;  %v172_v2 = vadd.f32 %v171_v49, %v140_v41  ;;  %v207_v5 = vadd.f32 %v206_v63, %v489_v0  ;;  %p412_p0 = por %p411_p13, %p410_p12 }
  0x45   :  { %v195_v3 = vmul.f32 %v194_v55, %v192_v59  ;;  %v200_v4 = vand.u32 2147483647, %v199_v60  ;;  %v180_v6 = vadd.f32 %v179_v58, %v148_v45  ;;  %v210_v7 = vstv %s619_s19 }
  0x46   :  { %v215_v8 = vadd.f32 %v214_v1, %v489_v0  ;;  %v222_v9 = vstv %s621_s20  ;;  %v208_v12 = vand.u32 2147483647, %v207_v5  ;;  %v218_v13 = vstv %s624_s21  ;;  %p413_p1 = pnand %p412_p0, %p406_p11 }
  0x47   :  { %v203_v10 = vmul.f32 %v202_v62, %v200_v4  ;;  %v223_v14 = vadd.f32 %v222_v9, %v489_v0  ;;  %v188_v15 = vadd.f32 %v187_v61, %v156_v53  ;;  %v226_v17 = vstv %s629_s22 }
  0x48   :  { %v216_v16 = vand.u32 2147483647, %v215_v8  ;;  %v230_v18 = vstv %s631_s23  ;;  %v196_v19 = vadd.f32 %v195_v3, %v164_v57  ;;  %v211_v20 = vmul.f32 %v210_v7, %v208_v12 }
  0x49   :  { %v224_v21 = vand.u32 2147483647, %v223_v14  ;;  %v231_v22 = vadd.f32 %v230_v18, %v489_v0  ;;  %v234_v24 = vstv %s635_s24  ;;  %v238_v25 = vstv %s639_s25 }
  0x4a   :  { %v219_v23 = vmul.f32 %v218_v13, %v216_v16  ;;  %v246_v26 = vstv %s641_s26  ;;  %v204_v27 = vadd.f32 %v203_v10, %v172_v2  ;;  %v239_v30 = vadd.f32 %v238_v25, %v489_v0 }
  0x4b   :  { %v227_v28 = vmul.f32 %v226_v17, %v224_v21  ;;  %v232_v29 = vand.u32 2147483647, %v231_v22  ;;  %v212_v31 = vadd.f32 %v211_v20, %v180_v6  ;;  %v242_v32 = vstv %s647_s27 }
  0x4c   :  { %v247_v33 = vadd.f32 %v246_v26, %v489_v0  ;;  %v254_v34 = vstv %s649_s0  ;;  %v240_v36 = vand.u32 2147483647, %v239_v30  ;;  %v250_v37 = vstv %s652_s28 }
  0x4d   :  { %v235_v35 = vmul.f32 %v234_v24, %v232_v29  ;;  %v255_v38 = vadd.f32 %v254_v34, %v489_v0  ;;  %v220_v39 = vadd.f32 %v219_v23, %v188_v15  ;;  %v258_v41 = vstv %s657_s29 }
  0x4e   :  { %v248_v40 = vand.u32 2147483647, %v247_v33  ;;  %v262_v42 = vstv %s659_s30  ;;  %v228_v43 = vadd.f32 %v227_v28, %v196_v19  ;;  %v243_v44 = vmul.f32 %v242_v32, %v240_v36 }
  0x4f   :  { %v256_v45 = vand.u32 2147483647, %v255_v38  ;;  %v263_v46 = vadd.f32 %v262_v42, %v489_v0  ;;  %v266_v48 = vstv %s663_s3  ;;  %v270_v49 = vstv %s667_s4 }
  0x50   :  { %v251_v47 = vmul.f32 %v250_v37, %v248_v40  ;;  %v278_v50 = vstv %s669_s5  ;;  %v236_v51 = vadd.f32 %v235_v35, %v204_v27  ;;  %v271_v54 = vadd.f32 %v270_v49, %v489_v0 }
  0x51   :  { %v259_v52 = vmul.f32 %v258_v41, %v256_v45  ;;  %v264_v53 = vand.u32 2147483647, %v263_v46  ;;  %v244_v55 = vadd.f32 %v243_v44, %v212_v31  ;;  %v274_v56 = vstv %s675_s6 }
  0x52   :  { %v279_v57 = vadd.f32 %v278_v50, %v489_v0  ;;  %v272_v60 = vand.u32 2147483647, %v271_v54  ;;  %v282_v61 = vstv %s678_s7  ;;  %v252_v62 = vadd.f32 %v251_v47, %v220_v39 }
  0x53   :  { %v260_v58 = vadd.f32 %v259_v52, %v228_v43  ;;  %v267_v59 = vmul.f32 %v266_v48, %v264_v53 }
  0x54   :  { %v280_v63 = vand.u32 2147483647, %v279_v57  ;;  %v275_v2 = vmul.f32 %v274_v56, %v272_v60 }
  0x55   :  { %v268_v1 = vadd.f32 %v267_v59, %v236_v51  ;;  %v285_v3 = vadd.f32 %v260_v58, %v510_v11 }
  0x56   :  { %v283_v4 = vmul.f32 %v282_v61, %v280_v63  ;;  %v276_v5 = vadd.f32 %v275_v2, %v244_v55 }
  0x57   :  { %v286_v6 = vadd.f32 %v285_v3, %v268_v1 }
  0x58   :  { %v284_v7 = vadd.f32 %v283_v4, %v252_v62 }
  0x59   :  { %v287_v8 = vadd.f32 %v286_v6, %v276_v5 }
  0x5b   :  { %v288_v9 = vadd.f32 %v287_v8, %v284_v7 }
  0x5d   :  { %289 = vst [vmem:[#allocation7] sm:$0xff] %v288_v9 }
  0x5e   :  { %416 = shalt.err (!%p413_p1)
}
  0x5f   :  { %s417_s1 = scalar_lea.hbm %s710_s2, 128 }
  0x60   :  { %p418_p2 = scmp.ne.s32.totalorder %s710_s2, %s417_s1  ;;  %p421_p3 = scmp.lt.u32.totalorder %s417_s1, %s710_s2 }
  0x62   :  { %p423_p4 = pnand %p421_p3, %p418_p2 }
  0x64   :  { %426 = shalt.err (!%p423_p4)
}
  0x65   :  { %299 = dma.vmem_to_hbm [thread:$0]  %s297_s9, 128, %s710_s2, [#allocation6]  }
  0x66   :  { %431 = dma.done.wait [#allocation6], 128  }
  0x67   :  { %432 = vsyncadd [#allocation6], 4294967168 }
  0x68   :  { %303 = vsyncpa [#allocation5], 1 }
  0x69   :  { %304 = vsyncpa [#allocation6], 1 }

</bundles_post_ra>
